<compile_context>
chip_gen: v7x
topology: tpu7x:2x2x1
jax: 0.10.0
libtpu: 0.0.40
codegen_flags: <defaults>
</compile_context>

<pallas_src>
import jax
import jax.numpy as jnp
from jax.experimental import pallas as pl
from jax.experimental.pallas import tpu as pltpu

RMS_EPS = 1.1920929e-07  # torch.finfo(torch.float32).eps (torch RMSNorm default eps=None)
_HALO_OFF = 128          # lane offset of the (aligned) staged tile inside the scratch


def _residual_connect_kernel(K, C_in, C_out, tT):
    """Build the kernel body. Static: conv kernel size K, channels, time tile tT."""
    halo = K - 1
    base = _HALO_OFF - halo   # first lane of the K-tap sliding window

    def kernel(x_ref, res_ref, w_ref, b_ref, g_ref, o_ref, xext_ref):
        # x_ref:    (1, C_in, tT)          current time tile of the input (NCW)
        # res_ref:  (1, C_out, tT)         current time tile of the residual (NCW)
        # w_ref:    (C_out, K*C_in)        folded conv weight: w2d[o, k*C_in+i] = w[o, i, k]
        # b_ref:    (C_out, 1)             conv bias
        # g_ref:    (C_out, 1)             RMSNorm affine weight
        # o_ref:    (1, C_out, tT)
        # xext_ref: (C_in, _HALO_OFF+tT)   f32 staging buffer; lanes [base, _HALO_OFF)
        #           hold the K-1 causal-halo samples, lanes [_HALO_OFF, _HALO_OFF+tT)
        #           hold the current tile (lane-aligned store).
        j = pl.program_id(1)

        if halo > 0:
            @pl.when(j == 0)
            def _():
                # first time tile of each sequence: causal left-pad with zeros (on-chip)
                xext_ref[:, base:_HALO_OFF] = jnp.zeros((C_in, halo), jnp.float32)

        # stage the current tile, lane-aligned
        xext_ref[:, _HALO_OFF:] = x_ref[0].astype(jnp.float32)

        # --- CausalConv1d as ONE folded MXU contraction ---
        # rhs[k*C_in + ci, t] = x_ext[ci, t + k]   (ref slices -> offsets folded into loads)
        rhs = jnp.concatenate(
            [xext_ref[:, base + k: base + k + tT] for k in range(K)], axis=0)
        acc = jnp.dot(w_ref[...].astype(jnp.float32), rhs,
                      preferred_element_type=jnp.float32)             # (C_out, tT)
        acc = acc + b_ref[...].astype(jnp.float32)                     # lane-broadcast bias

        # --- RMSNorm over the channel (sublane) axis of the residual ---
        res = res_ref[0].astype(jnp.float32)                           # (C_out, tT)
        ms = jnp.mean(res * res, axis=0, keepdims=True)                # (1, tT)  XLU reduce
        rn = res * jax.lax.rsqrt(ms + RMS_EPS) * g_ref[...].astype(jnp.float32)

        # --- add + ReLU postact; lane-dense store ---
        o_ref[0] = jnp.maximum(acc + rn, 0.0).astype(o_ref.dtype)

        # --- carry the last K-1 samples of this tile as the next tile's halo ---
        if halo > 0:
            xext_ref[:, base:_HALO_OFF] = x_ref[0, :, tT - halo:].astype(jnp.float32)

    return kernel


def residual_connect(x_nct, res_nct, conv_w, conv_b, rms_gamma, *, time_tile=512):
    """ResidualConnect(connect_type='mix', norm='rms', postact='relu') forward.

    Args (PyTorch conventions, NCW):
      x_nct:     (B, C_in, T_in)   float32
      res_nct:   (B, C_out, T)     float32
      conv_w:    (C_out, C_in, K)  CausalConv1d weight
      conv_b:    (C_out,)          CausalConv1d bias
      rms_gamma: (C_out,)          RMSNorm weight
    Returns: (B, C_out, T) float32, NCW (no layout glue around the kernel).
    """
    B, C_in, T_in = x_nct.shape
    Br, C_out, T = res_nct.shape
    K = conv_w.shape[2]
    assert Br == B, "batch mismatch between input and residual"
    if T_in < T:
        raise ValueError(f"input length {T_in} shorter than residual length {T}")

    # input[..., -T:]  (a no-op when T_in == T, the common case)
    x = x_nct if T_in == T else x_nct[:, :, T_in - T:]

    # Time tile: a multiple of 128 (lane axis) when possible, else the full sequence.
    if T % 128 == 0 and T > time_tile:
        tT = max(128, (time_tile // 128) * 128)
    else:
        tT = T
    n_t = pl.cdiv(T, tT)

    # Fold the K taps into the contraction dim: w2d[o, k*C_in + i] = w[o, i, k].
    w2d = jnp.transpose(conv_w, (0, 2, 1)).reshape(C_out, K * C_in)
    b2 = conv_b.reshape(C_out, 1)
    g2 = rms_gamma.reshape(C_out, 1)

    itemsize = 4
    cost = pl.CostEstimate(
        flops=2 * B * T * K * C_in * C_out + 6 * B * T * C_out,
        transcendentals=B * T,                       # rsqrt per time column
        bytes_accessed=itemsize * (B * C_in * T + 2 * B * C_out * T
                                   + C_out * K * C_in + 2 * C_out),
    )

    return pl.pallas_call(
        _residual_connect_kernel(K, C_in, C_out, tT),
        out_shape=jax.ShapeDtypeStruct((B, C_out, T), res_nct.dtype),
        grid_spec=pltpu.PrefetchScalarGridSpec(
            num_scalar_prefetch=0,
            grid=(B, n_t),
            in_specs=[
                pl.BlockSpec((1, C_in, tT), lambda b, j: (b, 0, j)),
                pl.BlockSpec((1, C_out, tT), lambda b, j: (b, 0, j)),
                pl.BlockSpec((C_out, K * C_in), lambda b, j: (0, 0)),
                pl.BlockSpec((C_out, 1), lambda b, j: (0, 0)),
                pl.BlockSpec((C_out, 1), lambda b, j: (0, 0)),
            ],
            out_specs=pl.BlockSpec((1, C_out, tT), lambda b, j: (b, 0, j)),
            scratch_shapes=[pltpu.VMEM((C_in, _HALO_OFF + tT), jnp.float32)],
        ),
        compiler_params=pltpu.CompilerParams(
            # Batch axis may split across megacore TCs; the time axis carries the
            # causal halo in scratch, so it must stay sequential.
            dimension_semantics=("parallel", "arbitrary"),
            vmem_limit_bytes=32 * 1024 * 1024,
        ),
        cost_estimate=cost,
    )(x, res_nct, w2d, b2, g2)


def _reference(x_nct, res_nct, conv_w, conv_b, rms_gamma):
    """Pure-JAX reference mirroring the PyTorch forward."""
    _, _, _ = x_nct.shape
    _, C_out, T = res_nct.shape
    K = conv_w.shape[2]
    x = x_nct[..., -T:]
    x = jnp.pad(x, ((0, 0), (0, 0), (K - 1, 0)))                    # causal pad
    conv = jax.lax.conv_general_dilated(
        x, conv_w, window_strides=(1,), padding="VALID",
        dimension_numbers=("NCH", "OIH", "NCH"))
    conv = conv + conv_b[None, :, None]
    r = res_nct
    ms = jnp.mean(r * r, axis=1, keepdims=True)                     # over channel dim
    rn = r * jax.lax.rsqrt(ms + RMS_EPS) * rms_gamma[None, :, None]
    return jnp.maximum(conv + rn, 0.0)


if __name__ == "__main__":
    B, C_in, C_out, T, K = 2, 32, 32, 256, 3   # connect_type='mix' allows C_in==C_out

    key = jax.random.PRNGKey(0)
    k1, k2, k3, k4 = jax.random.split(key, 4)
    x = jax.random.normal(k1, (B, C_in, T), dtype=jnp.float32)
    residual = jax.random.normal(k2, (B, C_out, T), dtype=jnp.float32)
    # Deterministic "checkpoint-free" parameter init (shapes match the nn.Module).
    conv_w = jax.random.normal(k3, (C_out, C_in, K), dtype=jnp.float32) * 0.1
    conv_b = jax.random.normal(k4, (C_out,), dtype=jnp.float32) * 0.01
    rms_gamma = jnp.ones((C_out,), dtype=jnp.float32)               # torch RMSNorm default

    # time_tile=128 -> grid (B, 2): exercises the cross-tile causal-halo carry.
    out = residual_connect(x, residual, conv_w, conv_b, rms_gamma, time_tile=128)
    out = jax.block_until_ready(out)

    ref = _reference(x, residual, conv_w, conv_b, rms_gamma)
    assert out.shape == (B, C_out, T)
    assert jnp.allclose(out, ref, atol=1e-4, rtol=1e-4), "mismatch vs reference"

    print("KERNEL_OK")
</pallas_src>

<mosaic_0001>
module attributes {stable_mosaic.version = 11 : i64} {
  func.func @kernel(%arg0: i32, %arg1: i32, %arg2: memref<1x32x128xf32, #tpu.memory_space<vmem>>, %arg3: memref<1x32x128xf32, #tpu.memory_space<vmem>>, %arg4: memref<32x96xf32, #tpu.memory_space<vmem>>, %arg5: memref<32x1xf32, #tpu.memory_space<vmem>>, %arg6: memref<32x1xf32, #tpu.memory_space<vmem>>, %arg7: memref<1x32x128xf32, #tpu.memory_space<vmem>>, %arg8: memref<32x256xf32, #tpu.memory_space<vmem>>) attributes {dimension_semantics = [#tpu.dimension_semantics<parallel>, #tpu.dimension_semantics<arbitrary>], iteration_bounds = array<i64: 2, 2>, scalar_prefetch = 0 : i64, scratch_operands = 1 : i64, tpu.core_type = #tpu.core_type<tc>, window_params = [{transform_indices = @transform_0, window_bounds = array<i64: 1, 32, 128>}, {transform_indices = @transform_1, window_bounds = array<i64: 1, 32, 128>}, {pipeline_mode = #tpu.pipeline_mode<synchronous>, transform_indices = @transform_2, window_bounds = array<i64: 32, 96>}, {pipeline_mode = #tpu.pipeline_mode<synchronous>, transform_indices = @transform_3, window_bounds = array<i64: 32, 1>}, {pipeline_mode = #tpu.pipeline_mode<synchronous>, transform_indices = @transform_4, window_bounds = array<i64: 32, 1>}, {transform_indices = @transform_5, window_bounds = array<i64: 1, 32, 128>}]} {
    %c0_i32 = arith.constant 0 : i32
    %0 = arith.cmpi eq, %arg1, %c0_i32 : i32
    %1 = arith.extui %0 : i1 to i32
    %c0_i32_0 = arith.constant 0 : i32
    %2 = arith.cmpi ne, %1, %c0_i32_0 : i32
    scf.if %2 {
      %cst_29 = arith.constant 0.000000e+00 : f32
      %39 = vector.broadcast %cst_29 : f32 to vector<32x2xf32>
      %c0_30 = arith.constant 0 : index
      %c126_31 = arith.constant 126 : index
      %40 = vector.load %arg8[%c0_30, %c126_31] : memref<32x256xf32, #tpu.memory_space<vmem>>, vector<32x2xf32>
      tpu.vector_store %arg8[%c0_30, %c126_31], %39 {strides = array<i32>} : memref<32x256xf32, #tpu.memory_space<vmem>>, vector<32x2xf32>,
    } else {
    }
    %c0 = arith.constant 0 : index
    %c0_1 = arith.constant 0 : index
    %c0_2 = arith.constant 0 : index
    %3 = vector.load %arg2[%c0, %c0_1, %c0_2] : memref<1x32x128xf32, #tpu.memory_space<vmem>>, vector<1x32x128xf32>
    %4 = vector.shape_cast %3 : vector<1x32x128xf32> to vector<32x128xf32>
    %c0_3 = arith.constant 0 : index
    %c128 = arith.constant 128 : index
    %5 = vector.load %arg8[%c0_3, %c128] : memref<32x256xf32, #tpu.memory_space<vmem>>, vector<32x128xf32>
    tpu.vector_store %arg8[%c0_3, %c128], %4 {strides = array<i32>} : memref<32x256xf32, #tpu.memory_space<vmem>>, vector<32x128xf32>,
    %c0_4 = arith.constant 0 : index
    %c126 = arith.constant 126 : index
    %6 = vector.load %arg8[%c0_4, %c126] : memref<32x256xf32, #tpu.memory_space<vmem>>, vector<32x128xf32>
    %c0_5 = arith.constant 0 : index
    %c127 = arith.constant 127 : index
    %7 = vector.load %arg8[%c0_5, %c127] : memref<32x256xf32, #tpu.memory_space<vmem>>, vector<32x128xf32>
    %c0_6 = arith.constant 0 : index
    %c128_7 = arith.constant 128 : index
    %8 = vector.load %arg8[%c0_6, %c128_7] : memref<32x256xf32, #tpu.memory_space<vmem>>, vector<32x128xf32>
    %9 = tpu.concatenate %6, %7, %8 in 0 : vector<32x128xf32>, vector<32x128xf32>, vector<32x128xf32> -> vector<96x128xf32>
    %c0_8 = arith.constant 0 : index
    %c0_9 = arith.constant 0 : index
    %10 = vector.load %arg4[%c0_8, %c0_9] : memref<32x96xf32, #tpu.memory_space<vmem>>, vector<32x96xf32>
    %cst = arith.constant dense<0.000000e+00> : vector<32x128xf32>
    %11 = tpu.matmul %10, %9, %cst {dimension_numbers = #tpu.dot_dimension_numbers<[1], [0], [0], [1], [0, 0, 1, 1], [], []>} : vector<32x96xf32>, vector<96x128xf32>, vector<32x128xf32> -> vector<32x128xf32>
    %c0_10 = arith.constant 0 : index
    %c0_11 = arith.constant 0 : index
    %12 = vector.load %arg5[%c0_10, %c0_11] : memref<32x1xf32, #tpu.memory_space<vmem>>, vector<32x1xf32>
    %13 = vector.broadcast %12 : vector<32x1xf32> to vector<32x128xf32>
    %14 = arith.addf %11, %13 : vector<32x128xf32>
    %c0_12 = arith.constant 0 : index
    %c0_13 = arith.constant 0 : index
    %c0_14 = arith.constant 0 : index
    %15 = vector.load %arg3[%c0_12, %c0_13, %c0_14] : memref<1x32x128xf32, #tpu.memory_space<vmem>>, vector<1x32x128xf32>
    %16 = vector.shape_cast %15 : vector<1x32x128xf32> to vector<32x128xf32>
    %17 = arith.mulf %16, %16 : vector<32x128xf32>
    %cst_15 = arith.constant dense<0.000000e+00> : vector<128xf32>
    %18 = vector.multi_reduction <add>, %17, %cst_15 [0] : vector<32x128xf32> to vector<128xf32>
    %19 = vector.shape_cast %18 : vector<128xf32> to vector<1x128xf32>
    %cst_16 = arith.constant 3.200000e+01 : f32
    %20 = vector.broadcast %cst_16 : f32 to vector<1x128xf32>
    %21 = arith.divf %19, %20 : vector<1x128xf32>
    %cst_17 = arith.constant 1.1920929E-7 : f32
    %22 = vector.broadcast %cst_17 : f32 to vector<1x128xf32>
    %23 = arith.addf %21, %22 : vector<1x128xf32>
    %24 = math.rsqrt %23 : vector<1x128xf32>
    %25 = vector.broadcast %24 : vector<1x128xf32> to vector<32x128xf32>
    %26 = arith.mulf %16, %25 : vector<32x128xf32>
    %c0_18 = arith.constant 0 : index
    %c0_19 = arith.constant 0 : index
    %27 = vector.load %arg6[%c0_18, %c0_19] : memref<32x1xf32, #tpu.memory_space<vmem>>, vector<32x1xf32>
    %28 = vector.broadcast %27 : vector<32x1xf32> to vector<32x128xf32>
    %29 = arith.mulf %26, %28 : vector<32x128xf32>
    %30 = arith.addf %14, %29 : vector<32x128xf32>
    %cst_20 = arith.constant 0.000000e+00 : f32
    %31 = vector.broadcast %cst_20 : f32 to vector<32x128xf32>
    %32 = arith.maximumf %30, %31 : vector<32x128xf32>
    %c0_21 = arith.constant 0 : index
    %c0_22 = arith.constant 0 : index
    %c0_23 = arith.constant 0 : index
    %33 = vector.load %arg7[%c0_21, %c0_22, %c0_23] : memref<1x32x128xf32, #tpu.memory_space<vmem>>, vector<1x32x128xf32>
    %34 = vector.shape_cast %33 : vector<1x32x128xf32> to vector<32x128xf32>
    %35 = vector.shape_cast %32 : vector<32x128xf32> to vector<1x32x128xf32>
    tpu.vector_store %arg7[%c0_21, %c0_22, %c0_23], %35 {strides = array<i32>} : memref<1x32x128xf32, #tpu.memory_space<vmem>>, vector<1x32x128xf32>,
    %c0_24 = arith.constant 0 : index
    %c0_25 = arith.constant 0 : index
    %c126_26 = arith.constant 126 : index
    %36 = vector.load %arg2[%c0_24, %c0_25, %c126_26] : memref<1x32x128xf32, #tpu.memory_space<vmem>>, vector<1x32x2xf32>
    %37 = vector.shape_cast %36 : vector<1x32x2xf32> to vector<32x2xf32>
    %c0_27 = arith.constant 0 : index
    %c126_28 = arith.constant 126 : index
    %38 = vector.load %arg8[%c0_27, %c126_28] : memref<32x256xf32, #tpu.memory_space<vmem>>, vector<32x2xf32>
    tpu.vector_store %arg8[%c0_27, %c126_28], %37 {strides = array<i32>} : memref<32x256xf32, #tpu.memory_space<vmem>>, vector<32x2xf32>,
    return
  }
  func.func @transform_0(%arg0: i32, %arg1: i32) -> (i32, i32, i32) {
    %c0_i32 = arith.constant 0 : i32
    %c0_i32_0 = arith.constant 0 : i32
    return %arg0, %c0_i32, %arg1 : i32, i32, i32
  }
  func.func @transform_1(%arg0: i32, %arg1: i32) -> (i32, i32, i32) {
    %c0_i32 = arith.constant 0 : i32
    %c0_i32_0 = arith.constant 0 : i32
    return %arg0, %c0_i32, %arg1 : i32, i32, i32
  }
  func.func @transform_2(%arg0: i32, %arg1: i32) -> (i32, i32) {
    %c0_i32 = arith.constant 0 : i32
    %c0_i32_0 = arith.constant 0 : i32
    %c0_i32_1 = arith.constant 0 : i32
    return %c0_i32, %c0_i32_0 : i32, i32
  }
  func.func @transform_3(%arg0: i32, %arg1: i32) -> (i32, i32) {
    %c0_i32 = arith.constant 0 : i32
    %c0_i32_0 = arith.constant 0 : i32
    %c0_i32_1 = arith.constant 0 : i32
    return %c0_i32, %c0_i32_0 : i32, i32
  }
  func.func @transform_4(%arg0: i32, %arg1: i32) -> (i32, i32) {
    %c0_i32 = arith.constant 0 : i32
    %c0_i32_0 = arith.constant 0 : i32
    %c0_i32_1 = arith.constant 0 : i32
    return %c0_i32, %c0_i32_0 : i32, i32
  }
  func.func @transform_5(%arg0: i32, %arg1: i32) -> (i32, i32, i32) {
    %c0_i32 = arith.constant 0 : i32
    %c0_i32_0 = arith.constant 0 : i32
    return %arg0, %c0_i32, %arg1 : i32, i32, i32
  }
}

</mosaic_0001>

<bundles_post_ra>
// kernel: tpu_custom_call.1
= control target key start
LH: loop header
LB: loop body
LE: loop exit
PB: predicated region body
PF: predicated region fallthrough
CT: control target
= control target key end

     0   :  { %s1581_s0 = inlined_call_operand.hbm [shape: f32[2,32,256], index: 0, kind: input, shape index: {}]   ;;  %s1582_s1 = inlined_call_operand.hbm [shape: f32[2,32,256], index: 1, kind: input, shape index: {}]   ;;  %s1583_s2 = inlined_call_operand.vmem [shape: f32[32,96], index: 2, kind: input, shape index: {}]   ;;  %s1584_s3 = inlined_call_operand.vmem [shape: f32[32,1], index: 3, kind: input, shape index: {}]   ;;  %s1585_s4 = inlined_call_operand.vmem [shape: f32[32,1], index: 4, kind: input, shape index: {}]   ;;  %s1586_s5 = inlined_call_operand.hbm [shape: f32[2,32,256], index: 5, kind: output, shape index: {}]  }
   0x1   :  { %1595 = sst [smem:[#allocation17_spill]] %s1581_s0 }
   0x2   :  { %10 = vsyncpa [#allocation4], 0 }
   0x3   :  { %12 = vsyncpa [#allocation4 + $0x1], 0 }
   0x4   :  { %13 = vsyncpa [#allocation7], 0 }
   0x5   :  { %15 = vsyncpa [#allocation7 + $0x1], 0 }
   0x6   :  { %16 = vsyncpa [#allocation5], 0 }
   0x7   :  { %18 = vsyncpa [#allocation5 + $0x1], 0  ;;  %s1246_s18 = smov 0   ;;  %s1248_s19 = smov 0  }
   0x8   :  { %s1250_s20 = smov 0   ;;  %s1252_s21 = smov 0  }
   0x9   :  { %s1254_s22 = smov 0   ;;  %s1256_s23 = smov 0  }
   0xa   :  { %s1258_s24 = smov 0   ;;  %s1260_s25 = smov 0  }
   0xb LB: > { %1596 = sst [smem:[#allocation12_spill]] %s1192_s23  ;;  %s754_s26 = sadd.s32 4294967295, %s1200_s25   ;;  %s1200_s25 = sphi %s1260_s25, %s24_s25   ;;  %s1196_s24 = sphi %s1258_s24, %s1618_s24   ;;  %s1192_s23 = sphi %s1256_s23, %s1617_s23   ;;  %s1188_s22 = sphi %s1254_s22, %s1616_s22   ;;  %s1184_s21 = sphi %s1252_s21, %s1615_s21   ;;  %s1180_s20 = sphi %s1250_s20, %s1621_s20   ;;  %s1176_s19 = sphi %s1248_s19, %s1620_s19   ;;  %s1172_s18 = sphi %s1246_s18, %s1619_s18  }
   0xc   : > { %1597 = sst [smem:[#allocation13_spill]] %s1196_s24  ;;  %s755_s27 = sadd.s32 4294967294, %s1200_s25  }
   0xd   : > { %s33_s28 = sadd.s32 1, %s1192_s23  ;;  %s36_s29 = sadd.s32 1, %s1196_s24 }
   0xe   : > { %p34_p0 = scmp.ge.s32.totalorder %s33_s28, 2  ;;  %s45_s30 = sadd.s32 1, %s1180_s20 }
   0xf   : > { %p52_p1 = scmp.ne.s32.totalorder %s1180_s20, %s1176_s19  ;;  %p53_p2 = scmp.eq.s32.totalorder %s1200_s25, 0 }
  0x10   : > { %s1623_s28 = smov (%p34_p0, %s33_s28), 0  ;;  %s1625_s29 = smov (!%p34_p0, %s36_s29), %s1196_s24 }
  0x11   : > { %1598 = sst [smem:[#allocation14_spill]] %s1623_s28  ;;  %s41_s6 = ssub.s32 %s1192_s23, %s1623_s28 }
  0x12   : > { %p1299_p3 = por %p53_p2, %p52_p1  ;;  %p38_p4 = scmp.ge.s32.totalorder %s1625_s29, 2 }
  0x13   : > { %p58_p5 = scmp.ne.s32.totalorder %s1176_s19, %s1172_s18  ;;  %p59_p6 = scmp.eq.s32.totalorder %s754_s26, 0 }
  0x14   : > { %p175_p7 = scmp.eq.s32.totalorder %s754_s26, 3  ;;  %s1627_s29 = smov (%p38_p4, %s1625_s29), 0 }
  0x15   : > { %1600 = sst [smem:[#allocation15_spill]] %s1627_s29  ;;  %p1307_p8 = por %p59_p6, %p58_p5 }
  0x16   : > { %p1311_p9 = por %p175_p7, %p52_p1  ;;  %s40_s10 = ssub.s32 %s1196_s24, %s1627_s29 }
  0x17   : > { %s1601_s8 = scalar_select %p1307_p8, 1, 0 }
  0x18   : > { %s1602_s9 = scalar_select %p1311_p9, 1, 0 }
  0x19   : > { %p181_p10 = scmp.eq.s32.totalorder %s755_s27, 3  ;;  %s42_s11 = sor.u32 %s41_s6, %s40_s10 }
  0x1a   : > { %p43_p11 = scmp.eq.s32.totalorder %s42_s11, 0  ;;  %p877_p13 = scmp.lt.s32.totalorder %s1200_s25, 4 }
  0x1b   : > { %p1317_p12 = por %p181_p10, %p58_p5  ;;  %s1323_s13 = sand.u32 1, %s1180_s20  }
  0x1c   : > { %s1326_s14 = scalar_select %p43_p11, %s1180_s20, %s45_s30  }
  0x1d   : > { %s1603_s12 = scalar_select %p1317_p12, 1, 0 }
  0x1e   : > { %1604 = sst [smem:[#allocation16_spill]] %s1326_s14  ;;  %s1588_s15 = sshll.u32 %s1323_s13, 5 }
  0x1f   : > { %s759_s16 = sshll.u32 %s1196_s24, 3  ;;  %s214_s26 = scalar_lea.vmem [#allocation3], %s1588_s15 }
  0x20   : > { %s1331_s17 = sadd.s32 %s1192_s23, %s759_s16  ;;  %s222_s27 = sshll.u32 %s214_s26, 4  ;;  %s1336_s27 = int_to_ptr.vmem [resolvable:$true] %s222_s27 }
  0x21   : > { %s1589_s6 = sshll.u32 %s1331_s17, 7  ;;  %s1605_s0 = sld [smem:[#allocation17_spill]] }
  0x22   : > { %p1347_p0 = pnand %p877_p13, %p1299_p3 }
  0x24   : > { %p1040_p2 = pneg %p1347_p0 }
  0x27   : > { %s1343_s29 = scalar_lea.hbm %s1605_s0, %s1589_s6  ;;  %s1043_s11 = scalar_lea.hbm %s1605_s0, 2048 }
  0x28   : > { %s1038_s26 = scalar_lea.hbm %s1343_s29, 512  ;;  %p1044_p3 = scmp.lt.u32.totalorder %s1343_s29, %s1605_s0 }
  0x29   : > { %p1039_p1 = scmp.ne.s32.totalorder %s1343_s29, %s1038_s26  ;;  %p1045_p6 = scmp.lt.u32.totalorder %s1043_s11, %s1038_s26 }
  0x2a   : > { %p1047_p10 = scmp.lt.u32.totalorder %s1038_s26, %s1343_s29 }
  0x2b   : > { %p1041_p4 = pnand %p1040_p2, %p1039_p1  ;;  %p1046_p7 = por %p1045_p6, %p1044_p3 }
  0x2d   : > { %p1042_p5 = pneg %p1041_p4  ;;  %p1048_p11 = por %p1047_p10, %p1046_p7 }
  0x2f   : > { %p1049_p13 = pnand %p1048_p11, %p1042_p5 }
  0x31   : > { %1052 = shalt.err (!%p1049_p13)
}
  0x32   : > { %s1053_s16 = scalar_lea.vmem %s1336_s27, 512  ;;  %s1202_s7 = smov [#allocation3]  }
  0x33   : > { %p1054_p1 = scmp.ne.s32.totalorder %s1336_s27, %s1053_s16  ;;  %s1058_s10 = sshll.u32 %s1202_s7, 4  ;;  %s1059_s10 = int_to_ptr.vmem [resolvable:$false] %s1058_s10 }
  0x34   : > { %s1060_s15 = scalar_lea.vmem %s1059_s10, 1024  ;;  %p1061_p9 = scmp.lt.s32.totalorder %s1336_s27, %s1059_s10 }
  0x35   : > { %p1056_p4 = pnand %p1054_p1, %p1040_p2  ;;  %p1062_p3 = scmp.lt.s32.totalorder %s1060_s15, %s1053_s16 }
  0x37   : > { %p1057_p12 = pneg %p1056_p4  ;;  %p1063_p6 = por %p1062_p3, %p1061_p9 }
  0x39   : > { %p1064_p7 = pnand %p1063_p6, %p1057_p12 }
  0x3b   : > { %1067 = shalt.err (!%p1064_p7)
}
  0x3c   : > { %s1203_s6 = smov 256   ;;  %s1204_s26 = smov 128  }
  0x3d   : > { %s1205_s11 = smov 8   ;;  %s1607_s16 = scalar_lea.sflag [#allocation4], %s1323_s13 }
  0x3e   : > { %869 = dma.hbm_to_vmem [thread:$0]  (!%p1347_p0), %s1343_s29, 512, %s1336_s27, %s1607_s16, %s1203_s6, %s1204_s26, %s1205_s11  }
  0x3f   : > { %p764_p9 = scmp.ge.s32.totalorder %s1200_s25, 1  ;;  %p252_p12 = scmp.lt.s32.totalorder %s1200_s25, 5 }
  0x40   : > { %s1609_s10 = sshll.u32 %s1331_s17, 7  ;;  %s1610_s24 = sshll.u32 %s1323_s13, 5 }
  0x41   : > { %p1384_p5 = pnand %p764_p9, %p252_p12  ;;  %s1393_s28 = scalar_lea.hbm %s1582_s1, %s1609_s10 }
  0x42   : > { %s236_s23 = scalar_lea.vmem [#allocation6], %s1610_s24  ;;  %s233_s29 = scalar_lea.sflag [#allocation7], %s1323_s13 }
  0x43   : > { %s244_s14 = sshll.u32 %s236_s23, 4  ;;  %s1068_s27 = scalar_lea.hbm %s1393_s28, 512  ;;  %s1397_s14 = int_to_ptr.vmem [resolvable:$true] %s244_s14 }
  0x44   : > { %p1069_p10 = scmp.ne.s32.totalorder %s1393_s28, %s1068_s27  ;;  %s1073_s16 = scalar_lea.hbm %s1582_s1, 2048 }
  0x45   : > { %p1074_p1 = scmp.lt.u32.totalorder %s1393_s28, %s1582_s1  ;;  %p1075_p4 = scmp.lt.u32.totalorder %s1073_s16, %s1068_s27 }
  0x46   : > { %p1071_p11 = pnand %p1069_p10, %p1040_p2  ;;  %p1077_p6 = scmp.lt.u32.totalorder %s1068_s27, %s1393_s28 }
  0x47   : > { %p1076_p3 = por %p1075_p4, %p1074_p1 }
  0x48   : > { %p1072_p13 = pneg %p1071_p11 }
  0x49   : > { %p1078_p7 = por %p1077_p6, %p1076_p3 }
  0x4b   : > { %p1079_p9 = pnand %p1078_p7, %p1072_p13 }
  0x4d   : > { %1082 = shalt.err (!%p1079_p9)
}
  0x4e   : > { %s1083_s23 = scalar_lea.vmem %s1397_s14, 512  ;;  %s1206_s24 = smov [#allocation6]  }
  0x4f   : > { %p1084_p12 = scmp.ne.s32.totalorder %s1397_s14, %s1083_s23  ;;  %s1088_s17 = sshll.u32 %s1206_s24, 4  ;;  %s1089_s17 = int_to_ptr.vmem [resolvable:$false] %s1088_s17 }
  0x50   : > { %s1090_s0 = scalar_lea.vmem %s1089_s17, 1024  ;;  %p1091_p8 = scmp.lt.s32.totalorder %s1397_s14, %s1089_s17 }
  0x51   : > { %p1086_p10 = pnand %p1084_p12, %p1040_p2  ;;  %p1092_p1 = scmp.lt.s32.totalorder %s1090_s0, %s1083_s23 }
  0x53   : > { %p1087_p11 = pneg %p1086_p10  ;;  %p1093_p4 = por %p1092_p1, %p1091_p8 }
  0x55   : > { %p1094_p3 = pnand %p1093_p4, %p1087_p11 }
  0x57   : > { %1097 = shalt.err (!%p1094_p3)
}
  0x58   : > { %872 = dma.hbm_to_vmem [thread:$0]  (!%p1347_p0), %s1393_s28, 512, %s1397_s14, %s233_s29, %s1203_s6, %s1204_s26, %s1205_s11  }
  0x59   : > { %256 = sbr.rel (%p1384_p5) target bundleno = 607 (0x25f), region = 40  ;;  %s1431_s27 = sand.u32 (!%p1384_p5), 1, %s1176_s19  }
  0x5a   : > { %s765_s16 = sshll.u32 (!%p1384_p5), %s1431_s27, 5  ;;  %s259_s10 = scalar_lea.sflag (!%p1384_p5), [#allocation4], %s1431_s27 }
  0x5b   : > { %s262_s30 = scalar_lea.vmem (!%p1384_p5), [#allocation3], %s765_s16  ;;  %p1611_p8 = scmp.ne.s32.totalorder (!%p1384_p5), %s1601_s8, 0 }
  0x60   : > { %1159 = dma.done.wait (%p1611_p8), %s259_s10, 512  }
  0x61   : > { %1161 = vsyncadd (%p1611_p8), %s259_s10, 4294966784  ;;  %s268_s28 = scalar_lea.sflag [#allocation7], %s1431_s27  ;;  %s1440_s13 = scalar_lea.vmem [#allocation6], %s765_s16 }
  0x62   : > { %1163 = dma.done.wait (%p1611_p8), %s268_s28, 512  }
  0x63   : > { %1165 = vsyncadd (%p1611_p8), %s268_s28, 4294966784  ;;  %s1446_s14 = scalar_lea.vmem [#allocation8], %s765_s16  ;;  %p768_p0 = scmp.ne.s32.totalorder %s1184_s21, 0 }
  0x64   : > { %vm307_vm0 = vcmask (!%p768_p0), 1048560   ;;  %v1207_v0 = vmov (!%p768_p0), 0.0  }
  0x65   : > { %306 = sbr.rel (%p768_p0) target bundleno = 108 (0x6c), region = 52  ;;  %308 = vst.msk [vmem:[#allocation2] sm:$0xff] (!%p768_p0), %vm307_vm0, %v1207_v0  ;;  %309 = vst.msk [vmem:[#allocation2 + $0x10] sm:$0xff] (!%p768_p0), %vm307_vm0, %v1207_v0 }
  0x66   : > { %310 = vst.msk [vmem:[#allocation2 + $0x20] sm:$0xff] (!%p768_p0), %vm307_vm0, %v1207_v0  ;;  %311 = vst.msk [vmem:[#allocation2 + $0x30] sm:$0xff] (!%p768_p0), %vm307_vm0, %v1207_v0 }
  0x6c PF: > { %v312_v1 = vld [vmem:[%s262_s30] sm:$0xff]  ;;  %vm621_vm1 = vcmask 1048560   ;;  %v314_v3 = vld [vmem:[%s262_s30 + $0x10] sm:$0xff]  ;;  %v313_v6 = vld [vmem:[%s262_s30 + $0x8] sm:$0xff]  ;;  %s1208_s8 = smov 127   ;;  %s1209_s6 = smov 126  }
  0x6d   : > { %v320_v2 = vld [vmem:[#allocation2] sm:$0xff]  ;;  %v322_v7 = vld [vmem:[#allocation2 + $0x10] sm:$0xff]  ;;  %v315_v9 = vld [vmem:[%s262_s30 + $0x18] sm:$0xff]  ;;  %v974_v13 = vpack.i.bf16 %v313_v6, %v312_v1  ;;  %s1210_s26 = smov 2   ;;  %vm352_vm2 = vcmask 1039360   ;;  %vm433_vm3 = vcmask 15360  }
  0x6e   : > { %622 = vst.msk [vmem:[#allocation2] sm:$0xff] %vm621_vm1, %v312_v1  ;;  %v954_v4 = vpack.i.bf16 %v312_v1, %v320_v2  ;;  %v324_v5 = vld [vmem:[#allocation2 + $0x20] sm:$0xff]  ;;  %623 = vst.msk [vmem:[#allocation2 + $0x10] sm:$0xff] %vm621_vm1, %v313_v6  ;;  %v326_v10 = vld [vmem:[#allocation2 + $0x30] sm:$0xff]  ;;  %v959_v11 = vpack.i.bf16 %v313_v6, %v322_v7  ;;  %v979_v14 = vpack.i.bf16 %v315_v9, %v314_v3  ;;  %vm454_vm4 = vcmask 785408   ;;  %p1612_p5 = scmp.ne.s32.totalorder %s1602_s9, 0 }
  0x6f   : > { %624 = vst.msk [vmem:[#allocation2 + $0x20] sm:$0xff] %vm621_vm1, %v314_v3  ;;  %v964_v8 = vpack.i.bf16 %v314_v3, %v324_v5  ;;  %625 = vst.msk [vmem:[#allocation2 + $0x30] sm:$0xff] %vm621_vm1, %v315_v9  ;;  %v969_v12 = vpack.i.bf16 %v315_v9, %v326_v10  ;;  %v365_v44 = vld [vmem:[%s1583_s2] sm:$0xff]  ;;  %v367_v45 = vld [vmem:[%s1583_s2 + $0x10] sm:$0xff]  ;;  %v1211_v59 = vmov 0   ;;  %s1212_s11 = smov [#allocation8]  }
  0x70   : > { %955 = vrot.lane.b32.xlu0 %v954_v4, %s1208_s8  ;;  %818 = vmatprep.mubr.msk.f32.mxu0 %vm454_vm4, %v365_v44  ;;  %v370_v55 = vld [vmem:[%s1584_s3 + $0x8] sm:$0xff]  ;;  %v369_v56 = vld [vmem:[%s1584_s3] sm:$0xff]  ;;  %v371_v60 = vld [vmem:[%s1584_s3 + $0x10] sm:$0xff]  ;;  %s1102_s7 = sshll.u32 %s1212_s11, 4  ;;  %s1103_s7 = int_to_ptr.vmem [resolvable:$false] %s1102_s7 }
  0x71   : > { %965 = vrot.lane.b32.xlu1 %v964_v8, %s1208_s8  ;;  %821 = vmatprep.mubr.msk.f32.mxu1 %vm454_vm4, %v367_v45  ;;  %v372_v61 = vld [vmem:[%s1584_s3 + $0x18] sm:$0xff]  ;;  %v577_v62 = vld [vmem:[%s1585_s4] sm:$0xff]  ;;  %v578_v63 = vld [vmem:[%s1585_s4 + $0x8] sm:$0xff]  ;;  %s1104_s29 = scalar_lea.vmem %s1103_s7, 1024 }
  0x72   : > { %1035 = vset.pattern.permute.xlu1 %v1211_v59  ;;  %1034 = vset.pattern.permute.xlu0 %v1211_v59  ;;  %v579_v0 = vld [vmem:[%s1585_s4 + $0x10] sm:$0xff]  ;;  %v580_v1 = vld [vmem:[%s1585_s4 + $0x18] sm:$0xff] }
  0x74   : > { %960 = vrot.lane.b32.xlu0 %v959_v11, %s1208_s8 }
  0x75   : > { %970 = vrot.lane.b32.xlu1 %v969_v12, %s1208_s8 }
  0x78   : > { %975 = vrot.lane.b32.xlu0 %v974_v13, %s1209_s6 }
  0x79   : > { %980 = vrot.lane.b32.xlu1 %v979_v14, %s1209_s6  ;;  %s627_s6 = scalar_lea.sflag [#allocation5], %s1431_s27 }
  0x7c   : > { %985 = vrot.lane.b32.xlu0 %v954_v4, %s1210_s26 }
  0x7d   : > { %990 = vrot.lane.b32.xlu1 %v959_v11, %s1210_s26 }
  0x80   : > { %995 = vrot.lane.b32.xlu0 %v964_v8, %s1210_s26 }
  0x81   : > { %1000 = vrot.lane.b32.xlu1 %v969_v12, %s1210_s26 }
  0xe2   : > { %v956_v15 = vpop.permute.xlu0 %955 }
  0xe3   : > { %v958_v16 = vunpack.i.h.bf16 %v956_v15  ;;  %v957_v17 = vunpack.i.l.bf16 %v956_v15  ;;  %v966_v18 = vpop.permute.xlu1 %965 }
  0xe4   : > { %v968_v19 = vunpack.i.h.bf16 %v966_v18  ;;  %v967_v20 = vunpack.i.l.bf16 %v966_v18 }
  0xe5   : > { %v353_v21 = vsel %vm352_vm2, %v957_v17, %v958_v16 }
  0xe6   : > { %v1004_v22 = vpack.i.bf16 %v958_v16, %v353_v21  ;;  %v355_v23 = vsel %vm352_vm2, %v967_v20, %v968_v19  ;;  %v961_v24 = vpop.permute.xlu0 %960 }
  0xe7   : > { %v963_v25 = vunpack.i.h.bf16 %v961_v24  ;;  %v962_v26 = vunpack.i.l.bf16 %v961_v24  ;;  %v971_v27 = vpop.permute.xlu1 %970  ;;  %v1014_v28 = vpack.i.bf16 %v968_v19, %v355_v23 }
  0xe8   : > { %1005 = vrot.lane.b32.xlu0 %v1004_v22, %s1210_s26  ;;  %v973_v29 = vunpack.i.h.bf16 %v971_v27  ;;  %v972_v30 = vunpack.i.l.bf16 %v971_v27 }
  0xe9   : > { %v354_v31 = vsel %vm352_vm2, %v962_v26, %v963_v25 }
  0xea   : > { %v1009_v32 = vpack.i.bf16 %v963_v25, %v354_v31  ;;  %v356_v33 = vsel %vm352_vm2, %v972_v30, %v973_v29  ;;  %v976_v34 = vpop.permute.xlu0 %975  ;;  %v552_v30 = vld [vmem:[%s1440_s13] sm:$0xff]  ;;  %v553_v31 = vld [vmem:[%s1440_s13 + $0x8] sm:$0xff] }
  0xeb   : > { %v981_v35 = vpop.permute.xlu1 %980  ;;  %v1019_v36 = vpack.i.bf16 %v973_v29, %v356_v33  ;;  %v368_v29 = vld [vmem:[%s1583_s2 + $0x18] sm:$0xff]  ;;  %v557_v33 = vmul.f32 %v553_v31, %v553_v31 }
  0xec   : > { %1010 = vrot.lane.b32.xlu1 %v1009_v32, %s1210_s26  ;;  %1015 = vrot.lane.b32.xlu0 %v1014_v28, %s1210_s26  ;;  %v366_v28 = vld [vmem:[%s1583_s2 + $0x8] sm:$0xff]  ;;  %v556_v32 = vmul.f32 %v552_v30, %v552_v30 }
  0xee   : > { %v986_v37 = vpop.permute.xlu0 %985 }
  0xef   : > { %v988_v38 = vunpack.i.h.bf16 %v986_v37  ;;  %v987_v39 = vunpack.i.l.bf16 %v986_v37  ;;  %v991_v40 = vpop.permute.xlu1 %990  ;;  %v555_v37 = vld [vmem:[%s1440_s13 + $0x18] sm:$0xff] }
  0xf0   : > { %1020 = vrot.lane.b32.xlu1 %v1019_v36, %s1210_s26  ;;  %1025 = vrot.lane.b32.xlu0 %v976_v34, %s1210_s26  ;;  %v993_v41 = vunpack.i.h.bf16 %v991_v40  ;;  %v992_v42 = vunpack.i.l.bf16 %v991_v40  ;;  %v554_v34 = vld [vmem:[%s1440_s13 + $0x10] sm:$0xff]  ;;  %v560_v36 = vadd.f32 %v557_v33, %v556_v32  ;;  %s774_s13 = sshll.u32 %s1188_s22, 3 }
  0xf1   : > { %v434_v43 = vsel %vm433_vm3, %v987_v39, %v988_v38  ;;  %v559_v38 = vmul.f32 %v555_v37, %v555_v37  ;;  %s638_s10 = sadd.s32 %s1184_s21, %s774_s13  ;;  %s641_s21 = sshll.u32 %s1446_s14, 4  ;;  %s1523_s21 = int_to_ptr.vmem [resolvable:$true] %s641_s21 }
  0xf2   : > { %v435_v46 = vsel %vm433_vm3, %v992_v42, %v993_v41  ;;  %v996_v47 = vpop.permute.xlu0 %995  ;;  %s775_s30 = sshll.u32 %s638_s10, 7  ;;  %p1105_p7 = scmp.lt.s32.totalorder %s1523_s21, %s1103_s7 }
  0xf3   : > { %v824_v48 = vpack.c.bf16 %v435_v46, %v434_v43  ;;  %v998_v49 = vunpack.i.h.bf16 %v996_v47  ;;  %v997_v50 = vunpack.i.l.bf16 %v996_v47  ;;  %v1001_v51 = vpop.permute.xlu1 %1000  ;;  %s1521_s8 = scalar_lea.hbm %s1586_s5, %s775_s30 }
  0xf4   : > { %1030 = vrot.lane.b32.xlu1 %v981_v35, %s1210_s26  ;;  %v1003_v52 = vunpack.i.h.bf16 %v1001_v51  ;;  %v1002_v53 = vunpack.i.l.bf16 %v1001_v51  ;;  %375 = vperm.xlu0 %1034, %v369_v56   ;;  %v558_v35 = vmul.f32 %v554_v34, %v554_v34  ;;  %s1098_s26 = scalar_lea.vmem %s1523_s21, 512 }
  0xf5   : > { %v436_v54 = vsel %vm433_vm3, %v997_v50, %v998_v49  ;;  %825 = vmatprep.subr.bf16.mxu0 %v824_v48  ;;  %848 = vmatprep.subr.bf16.mxu1 %v824_v48  ;;  %p1099_p2 = scmp.ne.s32.totalorder %s1523_s21, %s1098_s26  ;;  %p1106_p9 = scmp.lt.s32.totalorder %s1104_s29, %s1098_s26 }
  0xf6   : > { %v437_v57 = vsel %vm433_vm3, %v1002_v53, %v1003_v52  ;;  %827 = vmatpush3.bf16.msra.mxu0 %v824_v48  ;;  %854 = vmatpush3.bf16.msra.mxu1 %v824_v48  ;;  %v561_v39 = vadd.f32 %v560_v36, %v558_v35 }
  0xf7   : > { %v828_v58 = vpack.c.bf16 %v437_v57, %v436_v54  ;;  %p1100_p13 = pnand %p1099_p2, %p1612_p5  ;;  %p1107_p12 = por %p1106_p9, %p1105_p7 }
  0xf8   : > { %380 = vperm.xlu1 %1035, %v370_v55   ;;  %390 = vperm.xlu0 %1034, %v372_v61   ;;  %v562_v40 = vadd.f32 %v561_v39, %v559_v38 }
  0xf9   : > { %829 = vmatprep.subr.bf16.mxu0 %v828_v58  ;;  %849 = vmatprep.subr.bf16.mxu1 %v828_v58  ;;  %p1101_p6 = pneg %p1100_p13 }
  0xfa   : > { %831 = vmatpush3.bf16.msra.mxu0 %v828_v58  ;;  %855 = vmatpush3.bf16.msra.mxu1 %v828_v58  ;;  %v563_v41 = vrot.slane %v562_v40, 4 }
  0xfb   : > { %p1108_p10 = pnand %p1107_p12, %p1101_p6 }
  0xfc   : > { %385 = vperm.xlu1 %1035, %v371_v60   ;;  %588 = vperm.xlu0 %1034, %v578_v63   ;;  %v564_v42 = vadd.f32 %v563_v41, %v562_v40 }
  0xfe   : > { %v565_v43 = vrot.slane %v564_v42, 2 }
 0x100   : > { %583 = vperm.xlu1 %1035, %v577_v62   ;;  %598 = vperm.xlu0 %1034, %v580_v1   ;;  %v566_v44 = vadd.f32 %v565_v43, %v564_v42 }
 0x102   : > { %v567_v45 = vrot.slane %v566_v44, 1 }
 0x104   : > { %593 = vperm.xlu1 %1035, %v579_v0   ;;  %v568_v46 = vadd.f32 %v567_v45, %v566_v44 }
 0x106   : > { %v570_v47 = vmul.f32 0.03125, %v568_v46 }
 0x108   : > { %v571_v49 = vadd.f32 1.1920929e-07, %v570_v47 }
 0x10a   : > { %1036 = vrsqrt.f32 %v571_v49 }
 0x114   : > { %v1037_v55 = vpop.eup %1036 }
 0x115   : > { %v574_v56 = vmul.f32 %v1037_v55, %v553_v31  ;;  %v576_v57 = vmul.f32 %v1037_v55, %v555_v37  ;;  %v573_v58 = vmul.f32 %v1037_v55, %v552_v30  ;;  %v575_v59 = vmul.f32 %v1037_v55, %v554_v34 }
 0x15a   : > { %v1006_v2 = vpop.permute.xlu0 %1005 }
 0x15b   : > { %v1008_v3 = vunpack.i.h.bf16 %v1006_v2  ;;  %v1007_v4 = vunpack.i.l.bf16 %v1006_v2 }
 0x15d   : > { %v438_v9 = vsel %vm433_vm3, %v1007_v4, %v1008_v3 }
 0x15e   : > { %v1011_v5 = vpop.permute.xlu1 %1010  ;;  %v1016_v6 = vpop.permute.xlu0 %1015 }
 0x15f   : > { %v1013_v7 = vunpack.i.h.bf16 %v1011_v5  ;;  %v1012_v8 = vunpack.i.l.bf16 %v1011_v5  ;;  %v1018_v11 = vunpack.i.h.bf16 %v1016_v6  ;;  %v1017_v12 = vunpack.i.l.bf16 %v1016_v6 }
 0x161   : > { %v439_v10 = vsel %vm433_vm3, %v1012_v8, %v1013_v7  ;;  %v440_v20 = vsel %vm433_vm3, %v1017_v12, %v1018_v11 }
 0x162   : > { %v832_v13 = vpack.c.bf16 %v439_v10, %v438_v9  ;;  %v1021_v14 = vpop.permute.xlu1 %1020  ;;  %v1026_v15 = vpop.permute.xlu0 %1025 }
 0x163   : > { %v1023_v16 = vunpack.i.h.bf16 %v1021_v14  ;;  %v1022_v17 = vunpack.i.l.bf16 %v1021_v14  ;;  %v1028_v18 = vunpack.i.h.bf16 %v1026_v15  ;;  %v1027_v19 = vunpack.i.l.bf16 %v1026_v15 }
 0x164   : > { %833 = vmatprep.subr.bf16.mxu0 %v832_v13  ;;  %850 = vmatprep.subr.bf16.mxu1 %v832_v13 }
 0x165   : > { %v441_v21 = vsel %vm433_vm3, %v1022_v17, %v1023_v16  ;;  %835 = vmatpush3.bf16.msra.mxu0 %v832_v13  ;;  %856 = vmatpush3.bf16.msra.mxu1 %v832_v13  ;;  %v840_v23 = vpack.c.bf16 %v1028_v18, %v1027_v19 }
 0x166   : > { %v836_v22 = vpack.c.bf16 %v441_v21, %v440_v20  ;;  %v1031_v24 = vpop.permute.xlu1 %1030 }
 0x167   : > { %v1033_v25 = vunpack.i.h.bf16 %v1031_v24  ;;  %v1032_v26 = vunpack.i.l.bf16 %v1031_v24 }
 0x168   : > { %837 = vmatprep.subr.bf16.mxu0 %v836_v22  ;;  %851 = vmatprep.subr.bf16.mxu1 %v836_v22 }
 0x169   : > { %839 = vmatpush3.bf16.msra.mxu0 %v836_v22  ;;  %857 = vmatpush3.bf16.msra.mxu1 %v836_v22  ;;  %v844_v27 = vpack.c.bf16 %v1033_v25, %v1032_v26 }
 0x16a   : > { %841 = vmatprep.subr.bf16.mxu0 %v840_v23  ;;  %852 = vmatprep.subr.bf16.mxu1 %v840_v23 }
 0x16d   : > { %843 = vmatpush3.bf16.msra.mxu0 %v840_v23  ;;  %858 = vmatpush3.bf16.msra.mxu1 %v840_v23 }
 0x16e   : > { %845 = vmatprep.subr.bf16.mxu0 %v844_v27  ;;  %853 = vmatprep.subr.bf16.mxu1 %v844_v27 }
 0x171   : > { %847 = vmatpush3.bf16.msra.mxu0 %v844_v27  ;;  %859 = vmatpush3.bf16.msra.mxu1 %v844_v27 }
 0x173   : > { %v376_v48 = vpop.permute.xlu0 %375 }
 0x174   : > { %819 = vmatmul.mubr.msk.f32.vlgmr.msra.gmra.mrb[0].mxu0 %vm454_vm4, %v366_v28  ;;  %822 = vmatmul.mubr.msk.f32.vlgmr.msra.gmra.mrb[0].mxu1 %vm454_vm4, %v368_v29 }
 0x177   : > { %v381_v50 = vpop.permute.xlu1 %380  ;;  %v391_v51 = vpop.permute.xlu0 %390 }
 0x17b   : > { %v386_v52 = vpop.permute.xlu1 %385  ;;  %v589_v53 = vpop.permute.xlu0 %588 }
 0x17c   : > { %v602_v0 = vmul.f32 %v589_v53, %v574_v56 }
 0x17f   : > { %v584_v54 = vpop.permute.xlu1 %583  ;;  %v599_v60 = vpop.permute.xlu0 %598 }
 0x180   : > { %v604_v1 = vmul.f32 %v599_v60, %v576_v57  ;;  %v601_v6 = vmul.f32 %v584_v54, %v573_v58 }
 0x183   : > { %v594_v61 = vpop.permute.xlu1 %593 }
 0x184   : > { %v603_v7 = vmul.f32 %v594_v61, %v575_v59 }
 0x247   : > { %v820_v62 = vpop.f32.mrb[0].mxu0  ;;  %v823_v63 = vpop.f32.mrb[0].mxu1 }
 0x248   : > { %v539_v2 = vadd.f32 %v820_v62, %v381_v50  ;;  %v549_v3 = vadd.f32 %v823_v63, %v391_v51  ;;  %v533_v4 = vpop.f32.mrb[1].mxu0  ;;  %v543_v5 = vpop.f32.mrb[1].mxu1 }
 0x249   : > { %v534_v8 = vadd.f32 %v533_v4, %v376_v48  ;;  %v544_v9 = vadd.f32 %v543_v5, %v386_v52 }
 0x24a   : > { %v606_v10 = vadd.f32 %v602_v0, %v539_v2  ;;  %v608_v11 = vadd.f32 %v604_v1, %v549_v3 }
 0x24b   : > { %v605_v12 = vadd.f32 %v601_v6, %v534_v8  ;;  %v607_v13 = vadd.f32 %v603_v7, %v544_v9 }
 0x24c   : > { %v610_v14 = vmax.f32 %v606_v10, 0.0  ;;  %v612_v15 = vmax.f32 %v608_v11, 0.0 }
 0x24d   : > { %v609_v16 = vmax.f32 %v605_v12, 0.0  ;;  %v611_v17 = vmax.f32 %v607_v13, 0.0 }
 0x24e   : > { %614 = vst [vmem:[%s1446_s14 + $0x8] sm:$0xff] %v610_v14  ;;  %616 = vst [vmem:[%s1446_s14 + $0x18] sm:$0xff] %v612_v15 }
 0x24f   : > { %613 = vst [vmem:[%s1446_s14] sm:$0xff] %v609_v16  ;;  %615 = vst [vmem:[%s1446_s14 + $0x10] sm:$0xff] %v611_v17 }
 0x250   : > { %1111 = shalt.err (!%p1108_p10)
}
 0x251   : > { %s1112_s14 = scalar_lea.hbm %s1521_s8, 512  ;;  %s1116_s24 = scalar_lea.hbm %s1586_s5, 2048 }
 0x252   : > { %p1113_p11 = scmp.ne.s32.totalorder %s1521_s8, %s1112_s14  ;;  %p1117_p3 = scmp.lt.u32.totalorder %s1521_s8, %s1586_s5 }
 0x253   : > { %p1118_p8 = scmp.lt.u32.totalorder %s1116_s24, %s1112_s14  ;;  %p1120_p2 = scmp.lt.u32.totalorder %s1112_s14, %s1521_s8 }
 0x254   : > { %p1114_p1 = pnand %p1113_p11, %p1612_p5 }
 0x255   : > { %p1119_p0 = por %p1118_p8, %p1117_p3 }
 0x256   : > { %p1115_p4 = pneg %p1114_p1 }
 0x257   : > { %p1121_p13 = por %p1120_p2, %p1119_p0 }
 0x259   : > { %p1122_p6 = pnand %p1121_p13, %p1115_p4 }
 0x25b   : > { %1125 = shalt.err (!%p1122_p6)
}
 0x25c   : > { %s1213_s16 = smov 128   ;;  %s1214_s13 = smov 256  }
 0x25d   : > { %s1215_s10 = smov 8  }
 0x25e   : > { %864 = dma.vmem_to_hbm [thread:$0]  (%p1612_p5), %s1523_s21, 512, %s1521_s8, %s627_s6, %s1213_s16, %s1214_s13, %s1215_s10  }
 0x25f PF: > { %p878_p7 = scmp.ge.s32.totalorder %s1200_s25, 2  ;;  %s656_s30 = sand.u32 1, %s1172_s18  }
 0x260   : > { %p1613_p9 = scmp.ne.s32.totalorder %s1603_s12, 0  ;;  %s657_s22 = scalar_lea.sflag [#allocation5], %s656_s30 }
 0x262   : > { %p874_p12 = pnand %p878_p7, %p1613_p9 }
 0x264   : > { %1167 = dma.done.wait (!%p874_p12), %s657_s22, 512  }
 0x265   : > { %1169 = vsyncadd (!%p874_p12), %s657_s22, 4294966784  ;;  %s24_s25 = sadd.s32 1, %s1200_s25   ;;  %s1614_s28 = sld [smem:[#allocation16_spill]] }
 0x266   : > { %p21_p10 = scmp.ge.s32.totalorder %s24_s25, 6   ;;  %s1615_s21 = sld [smem:[#allocation12_spill]] }
 0x267   : > { %s1616_s22 = sld [smem:[#allocation13_spill]]  ;;  %s1617_s23 = sld [smem:[#allocation14_spill]] }
 0x268   : > { %s1618_s24 = sld [smem:[#allocation15_spill]]  ;;  %s1619_s18 = smov %s1176_s19 }
 0x269   : > { %s1620_s19 = smov %s1180_s20  ;;  %23 = sbr.rel (!%p21_p10) target bundleno = 11 (0xb), region = 102 }
 0x26b   : > { %s1621_s20 = smov %s1614_s28 }
 0x270   :  { %662 = vsyncpa [#allocation4], 1 }
 0x271   :  { %664 = vsyncpa [#allocation4 + $0x1], 1 }
 0x272   :  { %665 = vsyncpa [#allocation7], 1 }
 0x273   :  { %667 = vsyncpa [#allocation7 + $0x1], 1 }
 0x274   :  { %668 = vsyncpa [#allocation5], 1 }
 0x275   :  { %670 = vsyncpa [#allocation5 + $0x1], 1 }

</bundles_post_ra>
